<compile_context>
chip_gen: v5e
topology: v5e:2x2
jax: 0.10.0
libtpu: 0.0.40
codegen_flags: <defaults>
</compile_context>

<pallas_src>
import jax
import jax.numpy as jnp
from jax.experimental import pallas as pl
from jax.experimental.pallas import tpu as pltpu


K_IN = 784       # input features (28*28)
H1 = 256
H2 = 128
N_OUT = 10
N_PAD = 128      # lane-dense padded logits width (unmasked 128-lane stores)


def _round_up(x, m):
    return (x + m - 1) // m * m


def _choose_tb(b_eff, tb_max):
    """Batch tile: multiple of 16, capped at tb_max, and >= 2 tiles whenever the
    batch allows it so ("parallel",) can shard tiles across v7x's two TensorCores."""
    if b_eff < 32:
        return b_eff
    half = _round_up(max(b_eff // 2, 16), 16)
    return min(tb_max, half)


def fashion_mlp_kernel(x_ref, w1_ref, t1_ref, w2_ref, t2_ref, w3_ref, b3_ref, o_ref):
    # Layer 1: Linear(784->256) with BatchNorm folded into (w1, t1), then ReLU.
    # x arrives as f32 straight from HBM; cast to bf16 only when feeding the MXU.
    x = x_ref[...].astype(jnp.bfloat16)
    h1 = jnp.dot(x, w1_ref[...], preferred_element_type=jnp.float32)
    h1 = jnp.maximum(h1 + t1_ref[...], 0.0)
    # Dropout(0.3): identity at inference.

    # Layer 2: Linear(256->128) with folded BatchNorm, then ReLU.
    h2 = jnp.dot(h1.astype(jnp.bfloat16), w2_ref[...], preferred_element_type=jnp.float32)
    h2 = jnp.maximum(h2 + t2_ref[...], 0.0)
    # Dropout(0.3): identity at inference.

    # Layer 3: Linear(128->10), padded to 128 output lanes (sliced in the wrapper).
    logits = jnp.dot(h2.astype(jnp.bfloat16), w3_ref[...], preferred_element_type=jnp.float32)
    o_ref[...] = (logits + b3_ref[...]).astype(o_ref.dtype)   # bf16, lane-dense store


def fashion_classifier_forward(x, kp, *, tb=1024):
    """x: [B, 784] float32. kp: folded/padded kernel params. Returns [B, 10] float32."""
    B = x.shape[0]

    # Only pad the batch when B is not a multiple of 16 (sublane packing of the bf16
    # output tiles); the common perf case (B % 16 == 0) streams x with no copy at all.
    B_eff = _round_up(max(B, 16), 16)
    if B_eff != B:
        x_in = jnp.zeros((B_eff, K_IN), x.dtype).at[:B, :].set(x)
    else:
        x_in = x

    TB = _choose_tb(B_eff, tb)
    grid = (pl.cdiv(B_eff, TB),)   # partial edge tile is fine: batch rows are independent

    w1, t1 = kp["w1"], kp["t1"]
    w2, t2 = kp["w2"], kp["t2"]
    w3, b3 = kp["w3"], kp["b3"]

    def resident(shape):
        # Block index never changes -> loaded once, stays in VMEM, single buffer.
        return pl.BlockSpec(shape, lambda i: (0, 0), pipeline_mode=pl.Buffered(1))

    flops = 2 * B_eff * (K_IN * H1 + H1 * H2 + H2 * N_PAD)
    bytes_accessed = (
        B_eff * K_IN * 4                          # f32 activations streamed in
        + (w1.size + w2.size + w3.size) * 2       # bf16 resident weights
        + (t1.size + t2.size + b3.size) * 4       # f32 shifts / bias
        + B_eff * N_PAD * 2                       # bf16 padded logits out
    )

    out = pl.pallas_call(
        fashion_mlp_kernel,
        out_shape=jax.ShapeDtypeStruct((B_eff, N_PAD), jnp.bfloat16),
        grid=grid,
        in_specs=[
            pl.BlockSpec((TB, K_IN), lambda i: (i, 0)),   # streamed f32 x tiles
            resident((K_IN, H1)),
            resident((1, H1)),
            resident((H1, H2)),
            resident((1, H2)),
            resident((H2, N_PAD)),
            resident((1, N_PAD)),
        ],
        out_specs=pl.BlockSpec((TB, N_PAD), lambda i: (i, 0)),
        compiler_params=pltpu.CompilerParams(
            dimension_semantics=("parallel",),
            vmem_limit_bytes=32 * 1024 * 1024,
        ),
        cost_estimate=pl.CostEstimate(
            flops=flops, transcendentals=0, bytes_accessed=bytes_accessed),
    )(x_in, w1, t1, w2, t2, w3, b3)

    return out[:B, :N_OUT].astype(jnp.float32)


def init_params(key):
    """Deterministic parameter init mirroring the PyTorch module's shapes."""
    keys = jax.random.split(key, 10)

    def linear(kw, kb, fan_in, fan_out):
        bound = 1.0 / (fan_in ** 0.5)
        w = jax.random.uniform(kw, (fan_in, fan_out), jnp.float32, -bound, bound)
        b = jax.random.uniform(kb, (1, fan_out), jnp.float32, -bound, bound)
        return w, b

    w1, b1 = linear(keys[0], keys[1], K_IN, H1)
    w2, b2 = linear(keys[2], keys[3], H1, H2)
    w3, b3 = linear(keys[4], keys[5], H2, N_OUT)

    def bn(kg, kb, n):
        gamma = jax.random.uniform(kg, (1, n), jnp.float32, 0.5, 1.5)
        beta = jax.random.uniform(kb, (1, n), jnp.float32, -0.5, 0.5)
        mean = jnp.zeros((1, n), jnp.float32)
        var = jnp.ones((1, n), jnp.float32)
        return gamma, beta, mean, var

    g1, be1, m1, v1 = bn(keys[6], keys[7], H1)
    g2, be2, m2, v2 = bn(keys[8], keys[9], H2)

    return dict(w1=w1, b1=b1, g1=g1, be1=be1, m1=m1, v1=v1,
                w2=w2, b2=b2, g2=g2, be2=be2, m2=m2, v2=v2,
                w3=w3, b3=b3)


def fold_params(p, eps=1e-5):
    """Fold eval-mode BatchNorm into the linear layers; pad only the final layer's
    output dim (10 -> 128 lanes). No K padding of the streamed activations."""
    s1 = p["g1"] / jnp.sqrt(p["v1"] + eps)
    t1 = p["b1"] * s1 + p["be1"] - p["m1"] * s1
    s2 = p["g2"] / jnp.sqrt(p["v2"] + eps)
    t2 = p["b2"] * s2 + p["be2"] - p["m2"] * s2

    w1f = (p["w1"] * s1).astype(jnp.bfloat16)    # [784, 256], per-column scale folded
    w2f = (p["w2"] * s2).astype(jnp.bfloat16)    # [256, 128]
    w3p = jnp.zeros((H2, N_PAD), jnp.float32).at[:, :N_OUT].set(p["w3"]).astype(jnp.bfloat16)
    b3p = jnp.zeros((1, N_PAD), jnp.float32).at[:, :N_OUT].set(p["b3"])

    return dict(w1=w1f, t1=t1, w2=w2f, t2=t2, w3=w3p, b3=b3p)


def reference_forward(x, p, eps=1e-5):
    """Plain-JAX f32 reference of the same inference-mode forward pass."""
    s1 = p["g1"] / jnp.sqrt(p["v1"] + eps)
    s2 = p["g2"] / jnp.sqrt(p["v2"] + eps)
    h1 = jnp.maximum(((x @ p["w1"] + p["b1"]) - p["m1"]) * s1 + p["be1"], 0.0)
    h2 = jnp.maximum(((h1 @ p["w2"] + p["b2"]) - p["m2"]) * s2 + p["be2"], 0.0)
    return h2 @ p["w3"] + p["b3"]


if __name__ == "__main__":
    key = jax.random.PRNGKey(0)
    k_param, k_x = jax.random.split(key)

    params = init_params(k_param)
    kernel_params = fold_params(params)

    B = 16
    x = jax.random.normal(k_x, (B, K_IN), jnp.float32)

    out = fashion_classifier_forward(x, kernel_params)
    out = jax.block_until_ready(out)

    ref = reference_forward(x, params)
    assert out.shape == (B, N_OUT), out.shape
    # bf16 MXU operands + bf16 logit store vs f32 reference -> loosened tolerance.
    assert jnp.allclose(out, ref, atol=1e-1, rtol=5e-2), (
        "mismatch vs JAX reference: max abs diff = %f"
        % float(jnp.max(jnp.abs(out - ref))))

    print("KERNEL_OK")
</pallas_src>

<mosaic_0001>
module attributes {stable_mosaic.version = 11 : i64} {
  func.func @fashion_mlp_kernel(%arg0: i32, %arg1: memref<16x784xf32, #tpu.memory_space<vmem>>, %arg2: memref<784x256xbf16, #tpu.memory_space<vmem>>, %arg3: memref<1x256xf32, #tpu.memory_space<vmem>>, %arg4: memref<256x128xbf16, #tpu.memory_space<vmem>>, %arg5: memref<1x128xf32, #tpu.memory_space<vmem>>, %arg6: memref<128x128xbf16, #tpu.memory_space<vmem>>, %arg7: memref<1x128xf32, #tpu.memory_space<vmem>>, %arg8: memref<16x128xbf16, #tpu.memory_space<vmem>>) attributes {dimension_semantics = [#tpu.dimension_semantics<parallel>], iteration_bounds = array<i64: 1>, scalar_prefetch = 0 : i64, scratch_operands = 0 : i64, tpu.core_type = #tpu.core_type<tc>, window_params = [{transform_indices = @transform_0, window_bounds = array<i64: 16, 784>}, {pipeline_mode = #tpu.pipeline_mode<synchronous>, transform_indices = @transform_1, window_bounds = array<i64: 784, 256>}, {pipeline_mode = #tpu.pipeline_mode<synchronous>, transform_indices = @transform_2, window_bounds = array<i64: 1, 256>}, {pipeline_mode = #tpu.pipeline_mode<synchronous>, transform_indices = @transform_3, window_bounds = array<i64: 256, 128>}, {pipeline_mode = #tpu.pipeline_mode<synchronous>, transform_indices = @transform_4, window_bounds = array<i64: 1, 128>}, {pipeline_mode = #tpu.pipeline_mode<synchronous>, transform_indices = @transform_5, window_bounds = array<i64: 128, 128>}, {pipeline_mode = #tpu.pipeline_mode<synchronous>, transform_indices = @transform_6, window_bounds = array<i64: 1, 128>}, {transform_indices = @transform_7, window_bounds = array<i64: 16, 128>}]} {
    %c0 = arith.constant 0 : index
    %c0_0 = arith.constant 0 : index
    %0 = vector.load %arg1[%c0, %c0_0] : memref<16x784xf32, #tpu.memory_space<vmem>>, vector<16x784xf32>
    %1 = arith.truncf %0 : vector<16x784xf32> to vector<16x784xbf16>
    %c0_1 = arith.constant 0 : index
    %c0_2 = arith.constant 0 : index
    %2 = vector.load %arg2[%c0_1, %c0_2] : memref<784x256xbf16, #tpu.memory_space<vmem>>, vector<784x256xbf16>
    %cst = arith.constant dense<0.000000e+00> : vector<16x256xf32>
    %3 = tpu.matmul %1, %2, %cst {dimension_numbers = #tpu.dot_dimension_numbers<[1], [0], [0], [1], [0, 0, 1, 1], [], []>} : vector<16x784xbf16>, vector<784x256xbf16>, vector<16x256xf32> -> vector<16x256xf32>
    %c0_3 = arith.constant 0 : index
    %c0_4 = arith.constant 0 : index
    %4 = vector.load %arg3[%c0_3, %c0_4] : memref<1x256xf32, #tpu.memory_space<vmem>>, vector<1x256xf32>
    %5 = vector.broadcast %4 : vector<1x256xf32> to vector<16x256xf32>
    %6 = arith.addf %3, %5 : vector<16x256xf32>
    %cst_5 = arith.constant 0.000000e+00 : f32
    %7 = vector.broadcast %cst_5 : f32 to vector<16x256xf32>
    %8 = arith.maximumf %6, %7 : vector<16x256xf32>
    %9 = arith.truncf %8 : vector<16x256xf32> to vector<16x256xbf16>
    %c0_6 = arith.constant 0 : index
    %c0_7 = arith.constant 0 : index
    %10 = vector.load %arg4[%c0_6, %c0_7] : memref<256x128xbf16, #tpu.memory_space<vmem>>, vector<256x128xbf16>
    %cst_8 = arith.constant dense<0.000000e+00> : vector<16x128xf32>
    %11 = tpu.matmul %9, %10, %cst_8 {dimension_numbers = #tpu.dot_dimension_numbers<[1], [0], [0], [1], [0, 0, 1, 1], [], []>} : vector<16x256xbf16>, vector<256x128xbf16>, vector<16x128xf32> -> vector<16x128xf32>
    %c0_9 = arith.constant 0 : index
    %c0_10 = arith.constant 0 : index
    %12 = vector.load %arg5[%c0_9, %c0_10] : memref<1x128xf32, #tpu.memory_space<vmem>>, vector<1x128xf32>
    %13 = vector.broadcast %12 : vector<1x128xf32> to vector<16x128xf32>
    %14 = arith.addf %11, %13 : vector<16x128xf32>
    %cst_11 = arith.constant 0.000000e+00 : f32
    %15 = vector.broadcast %cst_11 : f32 to vector<16x128xf32>
    %16 = arith.maximumf %14, %15 : vector<16x128xf32>
    %17 = arith.truncf %16 : vector<16x128xf32> to vector<16x128xbf16>
    %c0_12 = arith.constant 0 : index
    %c0_13 = arith.constant 0 : index
    %18 = vector.load %arg6[%c0_12, %c0_13] : memref<128x128xbf16, #tpu.memory_space<vmem>>, vector<128x128xbf16>
    %cst_14 = arith.constant dense<0.000000e+00> : vector<16x128xf32>
    %19 = tpu.matmul %17, %18, %cst_14 {dimension_numbers = #tpu.dot_dimension_numbers<[1], [0], [0], [1], [0, 0, 1, 1], [], []>} : vector<16x128xbf16>, vector<128x128xbf16>, vector<16x128xf32> -> vector<16x128xf32>
    %c0_15 = arith.constant 0 : index
    %c0_16 = arith.constant 0 : index
    %20 = vector.load %arg7[%c0_15, %c0_16] : memref<1x128xf32, #tpu.memory_space<vmem>>, vector<1x128xf32>
    %21 = vector.broadcast %20 : vector<1x128xf32> to vector<16x128xf32>
    %22 = arith.addf %19, %21 : vector<16x128xf32>
    %23 = arith.truncf %22 : vector<16x128xf32> to vector<16x128xbf16>
    %c0_17 = arith.constant 0 : index
    %c0_18 = arith.constant 0 : index
    %24 = vector.load %arg8[%c0_17, %c0_18] : memref<16x128xbf16, #tpu.memory_space<vmem>>, vector<16x128xbf16>
    tpu.vector_store %arg8[%c0_17, %c0_18], %23 {strides = array<i32>} : memref<16x128xbf16, #tpu.memory_space<vmem>>, vector<16x128xbf16>,
    return
  }
  func.func @transform_0(%arg0: i32) -> (i32, i32) {
    %c0_i32 = arith.constant 0 : i32
    %c0_i32_0 = arith.constant 0 : i32
    return %arg0, %c0_i32 : i32, i32
  }
  func.func @transform_1(%arg0: i32) -> (i32, i32) {
    %c0_i32 = arith.constant 0 : i32
    %c0_i32_0 = arith.constant 0 : i32
    %c0_i32_1 = arith.constant 0 : i32
    return %c0_i32, %c0_i32_0 : i32, i32
  }
  func.func @transform_2(%arg0: i32) -> (i32, i32) {
    %c0_i32 = arith.constant 0 : i32
    %c0_i32_0 = arith.constant 0 : i32
    %c0_i32_1 = arith.constant 0 : i32
    return %c0_i32, %c0_i32_0 : i32, i32
  }
  func.func @transform_3(%arg0: i32) -> (i32, i32) {
    %c0_i32 = arith.constant 0 : i32
    %c0_i32_0 = arith.constant 0 : i32
    %c0_i32_1 = arith.constant 0 : i32
    return %c0_i32, %c0_i32_0 : i32, i32
  }
  func.func @transform_4(%arg0: i32) -> (i32, i32) {
    %c0_i32 = arith.constant 0 : i32
    %c0_i32_0 = arith.constant 0 : i32
    %c0_i32_1 = arith.constant 0 : i32
    return %c0_i32, %c0_i32_0 : i32, i32
  }
  func.func @transform_5(%arg0: i32) -> (i32, i32) {
    %c0_i32 = arith.constant 0 : i32
    %c0_i32_0 = arith.constant 0 : i32
    %c0_i32_1 = arith.constant 0 : i32
    return %c0_i32, %c0_i32_0 : i32, i32
  }
  func.func @transform_6(%arg0: i32) -> (i32, i32) {
    %c0_i32 = arith.constant 0 : i32
    %c0_i32_0 = arith.constant 0 : i32
    %c0_i32_1 = arith.constant 0 : i32
    return %c0_i32, %c0_i32_0 : i32, i32
  }
  func.func @transform_7(%arg0: i32) -> (i32, i32) {
    %c0_i32 = arith.constant 0 : i32
    %c0_i32_0 = arith.constant 0 : i32
    return %arg0, %c0_i32 : i32, i32
  }
}

</mosaic_0001>

<bundles_post_ra>
// kernel: tpu_custom_call.1
= control target key start
LH: loop header
LB: loop body
LE: loop exit
PB: predicated region body
PF: predicated region fallthrough
CT: control target
= control target key end

     0   :  { %12 = vsyncpa [#allocation3], 0  ;;  %s2097_s0 = inlined_call_operand.hbm [shape: f32[16,784], index: 0, kind: input, shape index: {}]   ;;  %s2098_s1 = inlined_call_operand.hbm [shape: bf16[784,256], index: 1, kind: input, shape index: {}]   ;;  %s2099_s2 = inlined_call_operand.hbm [shape: f32[1,256], index: 2, kind: input, shape index: {}]   ;;  %s2100_s3 = inlined_call_operand.hbm [shape: bf16[256,128], index: 3, kind: input, shape index: {}]   ;;  %s2101_s4 = inlined_call_operand.vmem [shape: f32[1,128], index: 4, kind: input, shape index: {}]   ;;  %s2102_s5 = inlined_call_operand.hbm [shape: bf16[128,128], index: 5, kind: input, shape index: {}]   ;;  %s2103_s6 = inlined_call_operand.vmem [shape: f32[1,128], index: 6, kind: input, shape index: {}]   ;;  %s2104_s7 = inlined_call_operand.hbm [shape: bf16[16,128], index: 7, kind: output, shape index: {}]  }
   0x1   :  { %13 = vsyncpa [#allocation6], 0 }
   0x2   :  { %14 = vsyncpa [#allocation9], 0  ;;  %s33_s26 = sshll.u32 %s2098_s1, 4  ;;  %s34_s26 = int_to_ptr.hbm [resolvable:$true] %s33_s26 }
   0x3   :  { %15 = vsyncpa [#allocation4], 0  ;;  %s1978_s27 = smov [#allocation5]   ;;  %s57_s8 = sshll.u32 %s2100_s3, 4  ;;  %s58_s8 = int_to_ptr.hbm [resolvable:$true] %s57_s8 }
   0x4   :  { %s35_s28 = sshll.u32 %s1978_s27, 4  ;;  %s1979_s9 = smov 128   ;;  %s36_s28 = int_to_ptr.vmem [resolvable:$true] %s35_s28 }
   0x5   :  { %s1980_s10 = smov 8   ;;  %s1981_s11 = smov [#allocation8]  }
   0x6   :  { %41 = dma.hbm_to_vmem [thread:$0]  %s34_s26, 12544, %s36_s28, [#allocation6], %s1979_s9, %s1979_s9, %s1980_s10  }
   0x7   :  { %s59_s12 = sshll.u32 %s1981_s11, 4  ;;  %s1982_s13 = smov 64   ;;  %s60_s12 = int_to_ptr.vmem [resolvable:$true] %s59_s12 }
   0x8   :  { %s1983_s14 = smov 4   ;;  %s20_s16 = sshll.u32 %s2097_s0, 4  ;;  %s21_s16 = int_to_ptr.hbm [resolvable:$true] %s20_s16 }
   0x9   :  { %65 = dma.hbm_to_vmem [thread:$0]  %s58_s8, 2048, %s60_s12, [#allocation9], %s1982_s13, %s1982_s13, %s1983_s14  }
   0xa   :  { %s1984_s17 = smov [#allocation2]   ;;  %s47_s20 = sshll.u32 %s2099_s2, 4  ;;  %s48_s20 = int_to_ptr.hbm [resolvable:$true] %s47_s20 }
   0xb   :  { %s22_s3 = sshll.u32 %s1984_s17, 4  ;;  %s1985_s21 = smov 896   ;;  %s23_s3 = int_to_ptr.vmem [resolvable:$true] %s22_s3 }
   0xc   :  { %s1986_s22 = smov 56   ;;  %s1987_s23 = smov [#allocation7]  }
   0xd   :  { %28 = dma.hbm_to_vmem [thread:$0]  %s21_s16, 1792, %s23_s3, [#allocation3], %s1985_s21, %s1985_s21, %s1986_s22  }
   0xe   :  { %s49_s24 = sshll.u32 %s1987_s23, 4  ;;  %s72_s27 = sshll.u32 %s2102_s5, 4  ;;  %s50_s24 = int_to_ptr.vmem [resolvable:$true] %s49_s24  ;;  %s73_s27 = int_to_ptr.hbm [resolvable:$true] %s72_s27 }
   0xf   :  { %52 = dma.hbm_to_vmem [thread:$0]  %s48_s20, 32, %s50_s24, [#allocation6]  }
  0x10   :  { %s1988_s0 = smov [#allocation10]  }
  0x11   :  { %s74_s28 = sshll.u32 %s1988_s0, 4  ;;  %s75_s28 = int_to_ptr.vmem [resolvable:$true] %s74_s28 }
  0x12   :  { %80 = dma.hbm_to_vmem [thread:$0]  %s73_s27, 1024, %s75_s28, [#allocation9], %s1982_s13, %s1982_s13, %s1983_s14  }
  0x13   :  { %1970 = dma.done.wait [#allocation3], 1792  }
  0x14   :  { %1971 = vsyncadd [#allocation3], 4294965504 }
  0x15   :  { %1972 = dma.done.wait [#allocation6], 12576  }
  0x16   :  { %1973 = vsyncadd [#allocation6], 4294954720 }
  0x17   :  { %1974 = dma.done.wait [#allocation9], 3072  }
  0x18   :  { %1975 = vsyncadd [#allocation9], 4294964224  ;;  %v1253_v0 = vld [vmem:[#allocation5 + $0x70] sm:$0xf]  ;;  %v1700_v1 = vld [vmem:[#allocation5 + $0x74] sm:$0xf0] }
  0x19   :  { %v1381_v2 = vld [vmem:[#allocation5 + $0x170] sm:$0xf]  ;;  %v1254_v3 = vor.u32 %v1700_v1, %v1253_v0  ;;  %v1732_v4 = vld [vmem:[#allocation5 + $0x174] sm:$0xf0]  ;;  %v1245_v11 = vld [vmem:[#allocation5 + $0x60] sm:$0xf] }
  0x1a   :  { %v1445_v5 = vld [vmem:[#allocation5 + $0x1f0] sm:$0xf]  ;;  %v1748_v6 = vld [vmem:[#allocation5 + $0x1f4] sm:$0xf0]  ;;  %v1382_v7 = vor.u32 %v1732_v4, %v1381_v2  ;;  %v1698_v13 = vld [vmem:[#allocation5 + $0x64] sm:$0xf0] }
  0x1b   :  { %v1446_v8 = vor.u32 %v1748_v6, %v1445_v5  ;;  %v1317_v9 = vld [vmem:[#allocation5 + $0xf0] sm:$0xf]  ;;  %v1716_v10 = vld [vmem:[#allocation5 + $0xf4] sm:$0xf0]  ;;  %723 = vmatpush.bf16.msra.mxu0 %v1254_v3  ;;  %v1373_v14 = vld [vmem:[#allocation5 + $0x160] sm:$0xf]  ;;  %v1246_v16 = vor.u32 %v1698_v13, %v1245_v11 }
  0x1c   :  { %v1318_v12 = vor.u32 %v1716_v10, %v1317_v9  ;;  %v1730_v15 = vld [vmem:[#allocation5 + $0x164] sm:$0xf0]  ;;  %751 = vmatpush.bf16.msra.mxu2 %v1382_v7  ;;  %v1437_v18 = vld [vmem:[#allocation5 + $0x1e0] sm:$0xf]  ;;  %v1237_v23 = vld [vmem:[#allocation5 + $0x50] sm:$0xf] }
  0x1d   :  { %765 = vmatpush.bf16.msra.mxu3 %v1446_v8  ;;  %v1374_v17 = vor.u32 %v1730_v15, %v1373_v14  ;;  %v1746_v19 = vld [vmem:[#allocation5 + $0x1e4] sm:$0xf0]  ;;  %v1309_v20 = vld [vmem:[#allocation5 + $0xe0] sm:$0xf]  ;;  %v1696_v24 = vld [vmem:[#allocation5 + $0x54] sm:$0xf0] }
  0x1e   :  { %737 = vmatpush.bf16.msra.mxu1 %v1318_v12  ;;  %v1438_v21 = vor.u32 %v1746_v19, %v1437_v18  ;;  %v1714_v22 = vld [vmem:[#allocation5 + $0xe4] sm:$0xf0]  ;;  %v1365_v26 = vld [vmem:[#allocation5 + $0x150] sm:$0xf]  ;;  %v1728_v27 = vld [vmem:[#allocation5 + $0x154] sm:$0xf0]  ;;  %v1238_v29 = vor.u32 %v1696_v24, %v1237_v23 }
  0x1f   :  { %v1310_v25 = vor.u32 %v1714_v22, %v1309_v20  ;;  %v1429_v28 = vld [vmem:[#allocation5 + $0x1d0] sm:$0xf]  ;;  %724 = vmatpush.bf16.msra.mxu0 %v1246_v16  ;;  %v1744_v30 = vld [vmem:[#allocation5 + $0x1d4] sm:$0xf0]  ;;  %v1366_v33 = vor.u32 %v1728_v27, %v1365_v26  ;;  %v1229_v35 = vld [vmem:[#allocation5 + $0x40] sm:$0xf] }
  0x20   :  { %v1301_v31 = vld [vmem:[#allocation5 + $0xd0] sm:$0xf]  ;;  %v1712_v32 = vld [vmem:[#allocation5 + $0xd4] sm:$0xf0]  ;;  %752 = vmatpush.bf16.msra.mxu2 %v1374_v17  ;;  %v1430_v34 = vor.u32 %v1744_v30, %v1429_v28  ;;  %v1694_v36 = vld [vmem:[#allocation5 + $0x44] sm:$0xf0] }
  0x21   :  { %766 = vmatpush.bf16.msra.mxu3 %v1438_v21  ;;  %v1357_v37 = vld [vmem:[#allocation5 + $0x140] sm:$0xf]  ;;  %v1302_v38 = vor.u32 %v1712_v32, %v1301_v31  ;;  %v1726_v39 = vld [vmem:[#allocation5 + $0x144] sm:$0xf0]  ;;  %v1230_v44 = vor.u32 %v1694_v36, %v1229_v35  ;;  %v1221_v47 = vld [vmem:[#allocation5 + $0x30] sm:$0xf] }
  0x22   :  { %738 = vmatpush.bf16.msra.mxu1 %v1310_v25  ;;  %v1421_v40 = vld [vmem:[#allocation5 + $0x1c0] sm:$0xf]  ;;  %v1742_v41 = vld [vmem:[#allocation5 + $0x1c4] sm:$0xf0]  ;;  %v1358_v45 = vor.u32 %v1726_v39, %v1357_v37  ;;  %v1692_v48 = vld [vmem:[#allocation5 + $0x34] sm:$0xf0] }
  0x23   :  { %v1293_v42 = vld [vmem:[#allocation5 + $0xc0] sm:$0xf]  ;;  %v1710_v43 = vld [vmem:[#allocation5 + $0xc4] sm:$0xf0]  ;;  %725 = vmatpush.bf16.msra.mxu0 %v1238_v29  ;;  %v1422_v46 = vor.u32 %v1742_v41, %v1421_v40  ;;  %v1349_v49 = vld [vmem:[#allocation5 + $0x130] sm:$0xf]  ;;  %v1222_v56 = vor.u32 %v1692_v48, %v1221_v47 }
  0x24   :  { %753 = vmatpush.bf16.msra.mxu2 %v1366_v33  ;;  %v1294_v50 = vor.u32 %v1710_v43, %v1293_v42  ;;  %v1724_v51 = vld [vmem:[#allocation5 + $0x134] sm:$0xf0]  ;;  %v1413_v52 = vld [vmem:[#allocation5 + $0x1b0] sm:$0xf]  ;;  %v1213_v59 = vld [vmem:[#allocation5 + $0x20] sm:$0xf] }
  0x25   :  { %767 = vmatpush.bf16.msra.mxu3 %v1430_v34  ;;  %v1740_v53 = vld [vmem:[#allocation5 + $0x1b4] sm:$0xf0]  ;;  %v1285_v54 = vld [vmem:[#allocation5 + $0xb0] sm:$0xf]  ;;  %v1350_v57 = vor.u32 %v1724_v51, %v1349_v49  ;;  %v1690_v60 = vld [vmem:[#allocation5 + $0x24] sm:$0xf0] }
  0x26   :  { %739 = vmatpush.bf16.msra.mxu1 %v1302_v38  ;;  %v1708_v55 = vld [vmem:[#allocation5 + $0xb4] sm:$0xf0]  ;;  %v1414_v58 = vor.u32 %v1740_v53, %v1413_v52  ;;  %v1341_v61 = vld [vmem:[#allocation5 + $0x120] sm:$0xf]  ;;  %v1722_v63 = vld [vmem:[#allocation5 + $0x124] sm:$0xf0]  ;;  %v1214_v4 = vor.u32 %v1690_v60, %v1213_v59 }
  0x27   :  { %726 = vmatpush.bf16.msra.mxu0 %v1230_v44  ;;  %v1286_v62 = vor.u32 %v1708_v55, %v1285_v54  ;;  %v1405_v0 = vld [vmem:[#allocation5 + $0x1a0] sm:$0xf]  ;;  %v1738_v1 = vld [vmem:[#allocation5 + $0x1a4] sm:$0xf0]  ;;  %v1205_v5 = vld [vmem:[#allocation5 + $0x10] sm:$0xf]  ;;  %v1342_v6 = vor.u32 %v1722_v63, %v1341_v61 }
  0x28   :  { %754 = vmatpush.bf16.msra.mxu2 %v1358_v45  ;;  %v1277_v2 = vld [vmem:[#allocation5 + $0xa0] sm:$0xf]  ;;  %v1706_v3 = vld [vmem:[#allocation5 + $0xa4] sm:$0xf0]  ;;  %v1406_v7 = vor.u32 %v1738_v1, %v1405_v0  ;;  %v1688_v8 = vld [vmem:[#allocation5 + $0x14] sm:$0xf0] }
  0x29   :  { %768 = vmatpush.bf16.msra.mxu3 %v1422_v46  ;;  %v1333_v9 = vld [vmem:[#allocation5 + $0x110] sm:$0xf]  ;;  %v1720_v10 = vld [vmem:[#allocation5 + $0x114] sm:$0xf0]  ;;  %v1278_v11 = vor.u32 %v1706_v3, %v1277_v2  ;;  %v1197_v16 = vld [vmem:[#allocation5] sm:$0xf]  ;;  %v1206_v18 = vor.u32 %v1688_v8, %v1205_v5 }
  0x2a   :  { %740 = vmatpush.bf16.msra.mxu1 %v1294_v50  ;;  %v1397_v12 = vld [vmem:[#allocation5 + $0x190] sm:$0xf]  ;;  %v1736_v13 = vld [vmem:[#allocation5 + $0x194] sm:$0xf0]  ;;  %v1686_v17 = vld [vmem:[#allocation5 + $0x4] sm:$0xf0]  ;;  %v1334_v23 = vor.u32 %v1720_v10, %v1333_v9 }
  0x2b   :  { %727 = vmatpush.bf16.msra.mxu0 %v1222_v56  ;;  %v1269_v14 = vld [vmem:[#allocation5 + $0x90] sm:$0xf]  ;;  %v1704_v15 = vld [vmem:[#allocation5 + $0x94] sm:$0xf0]  ;;  %v1325_v19 = vld [vmem:[#allocation5 + $0x100] sm:$0xf]  ;;  %v1398_v24 = vor.u32 %v1736_v13, %v1397_v12  ;;  %v1198_v35 = vor.u32 %v1686_v17, %v1197_v16 }
  0x2c   :  { %755 = vmatpush.bf16.msra.mxu2 %v1350_v57  ;;  %v1718_v20 = vld [vmem:[#allocation5 + $0x104] sm:$0xf0]  ;;  %v1389_v21 = vld [vmem:[#allocation5 + $0x180] sm:$0xf]  ;;  %v1509_v25 = vld [vmem:[#allocation5 + $0x270] sm:$0xf]  ;;  %v1270_v28 = vor.u32 %v1704_v15, %v1269_v14 }
  0x2d   :  { %769 = vmatpush.bf16.msra.mxu3 %v1414_v58  ;;  %v1734_v22 = vld [vmem:[#allocation5 + $0x184] sm:$0xf0]  ;;  %v1764_v26 = vld [vmem:[#allocation5 + $0x274] sm:$0xf0]  ;;  %v1699_v27 = vld [vmem:[#allocation5 + $0x74] sm:$0xf]  ;;  %v1326_v39 = vor.u32 %v1718_v20, %v1325_v19 }
  0x2e   :  { %741 = vmatpush.bf16.msra.mxu1 %v1286_v62  ;;  %v1255_v29 = vld [vmem:[#allocation5 + $0x78] sm:$0xf0]  ;;  %v1261_v30 = vld [vmem:[#allocation5 + $0x80] sm:$0xf]  ;;  %v1702_v31 = vld [vmem:[#allocation5 + $0x84] sm:$0xf0]  ;;  %v1390_v40 = vor.u32 %v1734_v22, %v1389_v21  ;;  %v1510_v44 = vor.u32 %v1764_v26, %v1509_v25 }
  0x2f   :  { %728 = vmatpush.bf16.msra.mxu0 %v1214_v4  ;;  %v106_v32 = vld [vmem:[#allocation2 + $0x10] sm:$0xff]  ;;  %v113_v33 = vld [vmem:[#allocation2 + $0x48] sm:$0xff]  ;;  %v1573_v34 = vld [vmem:[#allocation5 + $0x2f0] sm:$0xf]  ;;  %v1258_v45 = vor.u32 %v1699_v27, %v1255_v29  ;;  %v1262_v49 = vor.u32 %v1702_v31, %v1261_v30  ;;  %vm719_vm0 = vcmask 130048   ;;  %s1989_s8 = smov [#allocation11]  }
  0x30   :  { %756 = vmatpush.bf16.msra.mxu2 %v1342_v6  ;;  %v1780_v36 = vld [vmem:[#allocation5 + $0x2f4] sm:$0xf0]  ;;  %v1581_v37 = vld [vmem:[#allocation5 + $0x300] sm:$0xf]  ;;  %v1782_v38 = vld [vmem:[#allocation5 + $0x304] sm:$0xf0]  ;;  %v2051_v54 = vpack.c.bf16 %v113_v33, %v106_v32 }
  0x31   :  { %770 = vmatpush.bf16.msra.mxu3 %v1406_v7  ;;  %v1715_v41 = vld [vmem:[#allocation5 + $0xf4] sm:$0xf]  ;;  %v1319_v42 = vld [vmem:[#allocation5 + $0xf8] sm:$0xf0]  ;;  %v111_v46 = vld [vmem:[#allocation2 + $0x38] sm:$0xff]  ;;  %v1582_v50 = vor.u32 %v1782_v38, %v1581_v37  ;;  %v1574_v55 = vor.u32 %v1780_v36, %v1573_v34  ;;  %s1178_s9 = sshll.u32 %s1989_s8, 4  ;;  %s1179_s9 = int_to_ptr.vmem [resolvable:$true] %s1178_s9 }
  0x32   :  { %742 = vmatpush.bf16.msra.mxu1 %v1278_v11  ;;  %v104_v43 = vld [vmem:[#allocation2] sm:$0xff]  ;;  %v107_v47 = vld [vmem:[#allocation2 + $0x18] sm:$0xff]  ;;  %v114_v48 = vld [vmem:[#allocation2 + $0x50] sm:$0xff]  ;;  %v1322_v59 = vor.u32 %v1715_v41, %v1319_v42  ;;  %s1180_s11 = sshll.u32 %s2104_s7, 4  ;;  %s1181_s11 = int_to_ptr.hbm [resolvable:$true] %s1180_s11 }
  0x33   :  { %729 = vmatpush.bf16.msra.mxu0 %v1206_v18  ;;  %v1501_v51 = vld [vmem:[#allocation5 + $0x260] sm:$0xf]  ;;  %v1762_v52 = vld [vmem:[#allocation5 + $0x264] sm:$0xf0]  ;;  %v1697_v53 = vld [vmem:[#allocation5 + $0x64] sm:$0xf]  ;;  %v2053_v60 = vpack.c.bf16 %v111_v46, %v104_v43  ;;  %v2055_v63 = vpack.c.bf16 %v114_v48, %v107_v47 }
  0x34   :  { %757 = vmatpush.bf16.msra.mxu2 %v1334_v23  ;;  %v1247_v56 = vld [vmem:[#allocation5 + $0x68] sm:$0xf0]  ;;  %v105_v57 = vld [vmem:[#allocation2 + $0x8] sm:$0xff]  ;;  %v112_v58 = vld [vmem:[#allocation2 + $0x40] sm:$0xff]  ;;  %v1502_v0 = vor.u32 %v1762_v52, %v1501_v51 }
  0x35   :  { %771 = vmatpush.bf16.msra.mxu3 %v1398_v24  ;;  %v1565_v61 = vld [vmem:[#allocation5 + $0x2e0] sm:$0xf]  ;;  %v1778_v62 = vld [vmem:[#allocation5 + $0x2e4] sm:$0xf0]  ;;  %v1713_v1 = vld [vmem:[#allocation5 + $0xe4] sm:$0xf]  ;;  %v1250_v3 = vor.u32 %v1697_v53, %v1247_v56  ;;  %v2057_v4 = vpack.c.bf16 %v112_v58, %v105_v57 }
  0x36   :  { %743 = vmatpush.bf16.msra.mxu1 %v1270_v28  ;;  %v1311_v2 = vld [vmem:[#allocation5 + $0xe8] sm:$0xf0]  ;;  %v1493_v5 = vld [vmem:[#allocation5 + $0x250] sm:$0xf]  ;;  %v1760_v6 = vld [vmem:[#allocation5 + $0x254] sm:$0xf0]  ;;  %v1566_v7 = vor.u32 %v1778_v62, %v1565_v61 }
  0x37   :  { %730 = vmatpush.bf16.msra.mxu0 %v1198_v35  ;;  %v1695_v8 = vld [vmem:[#allocation5 + $0x54] sm:$0xf]  ;;  %v1239_v9 = vld [vmem:[#allocation5 + $0x58] sm:$0xf0]  ;;  %v1314_v10 = vor.u32 %v1713_v1, %v1311_v2  ;;  %v1557_v11 = vld [vmem:[#allocation5 + $0x2d0] sm:$0xf]  ;;  %v1494_v13 = vor.u32 %v1760_v6, %v1493_v5 }
  0x38   :  { %758 = vmatpush.bf16.msra.mxu2 %v1326_v39  ;;  %v1776_v12 = vld [vmem:[#allocation5 + $0x2d4] sm:$0xf0]  ;;  %v1711_v14 = vld [vmem:[#allocation5 + $0xd4] sm:$0xf]  ;;  %v1303_v15 = vld [vmem:[#allocation5 + $0xd8] sm:$0xf0]  ;;  %v1242_v16 = vor.u32 %v1695_v8, %v1239_v9 }
  0x39   :  { %772 = vmatpush.bf16.msra.mxu3 %v1390_v40  ;;  %v1485_v17 = vld [vmem:[#allocation5 + $0x240] sm:$0xf]  ;;  %v1758_v18 = vld [vmem:[#allocation5 + $0x244] sm:$0xf0]  ;;  %v1558_v19 = vor.u32 %v1776_v12, %v1557_v11  ;;  %v1693_v20 = vld [vmem:[#allocation5 + $0x44] sm:$0xf]  ;;  %v1306_v22 = vor.u32 %v1711_v14, %v1303_v15 }
  0x3a   :  { %744 = vmatpush.bf16.msra.mxu1 %v1262_v49  ;;  %731 = vmatmul.bf16.vlgmr.msra.gmra.mxu0 %v2053_v60  ;;  %v1231_v21 = vld [vmem:[#allocation5 + $0x48] sm:$0xf0]  ;;  %v1549_v23 = vld [vmem:[#allocation5 + $0x2c0] sm:$0xf]  ;;  %v1774_v24 = vld [vmem:[#allocation5 + $0x2c4] sm:$0xf0]  ;;  %v1486_v25 = vor.u32 %v1758_v18, %v1485_v17 }
  0x3b   :  { %779 = vmatpush.bf16.msrb.mxu0 %v1510_v44  ;;  %759 = vmatmul.bf16.vlgmr.msra.gmra.mxu2 %v2051_v54  ;;  %v1709_v26 = vld [vmem:[#allocation5 + $0xc4] sm:$0xf]  ;;  %v1295_v27 = vld [vmem:[#allocation5 + $0xc8] sm:$0xf0]  ;;  %v1234_v28 = vor.u32 %v1693_v20, %v1231_v21  ;;  %v1477_v29 = vld [vmem:[#allocation5 + $0x230] sm:$0xf]  ;;  %v1550_v31 = vor.u32 %v1774_v24, %v1549_v23 }
  0x3c   :  { %814 = vmatpush.bf16.msrb.mxu2 %v1582_v50  ;;  %773 = vmatmul.bf16.vlgmr.msra.gmra.mxu3 %v2055_v63  ;;  %v1756_v30 = vld [vmem:[#allocation5 + $0x234] sm:$0xf0]  ;;  %v1691_v32 = vld [vmem:[#allocation5 + $0x34] sm:$0xf]  ;;  %v1223_v33 = vld [vmem:[#allocation5 + $0x38] sm:$0xf0]  ;;  %v1298_v35 = vor.u32 %v1709_v26, %v1295_v27 }
  0x3d   :  { %821 = vmatpush.bf16.msrb.mxu3 %v1258_v45  ;;  %745 = vmatmul.bf16.vlgmr.msra.gmra.mxu1 %v2057_v4  ;;  %v1541_v34 = vld [vmem:[#allocation5 + $0x2b0] sm:$0xf]  ;;  %v1772_v36 = vld [vmem:[#allocation5 + $0x2b4] sm:$0xf0]  ;;  %v110_v37 = vld [vmem:[#allocation2 + $0x30] sm:$0xff]  ;;  %v1478_v39 = vor.u32 %v1756_v30, %v1477_v29  ;;  %v1226_v42 = vor.u32 %v1691_v32, %v1223_v33 }
  0x3e   :  { %793 = vmatpush.bf16.msrb.mxu1 %v1574_v55  ;;  %v117_v38 = vld [vmem:[#allocation2 + $0x68] sm:$0xff]  ;;  %v1707_v40 = vld [vmem:[#allocation5 + $0xb4] sm:$0xf]  ;;  %v1469_v43 = vld [vmem:[#allocation5 + $0x220] sm:$0xf]  ;;  %v1542_v45 = vor.u32 %v1772_v36, %v1541_v34 }
  0x3f   :  { %780 = vmatpush.bf16.msrb.mxu0 %v1502_v0  ;;  %v1287_v41 = vld [vmem:[#allocation5 + $0xb8] sm:$0xf0]  ;;  %v1754_v44 = vld [vmem:[#allocation5 + $0x224] sm:$0xf0]  ;;  %v1689_v46 = vld [vmem:[#allocation5 + $0x24] sm:$0xf]  ;;  %v2063_v48 = vpack.c.bf16 %v117_v38, %v110_v37 }
  0x40   :  { %835 = vmatpush.bf16.msra.mxu2 %v1322_v59  ;;  %v1215_v47 = vld [vmem:[#allocation5 + $0x28] sm:$0xf0]  ;;  %v1290_v49 = vor.u32 %v1707_v40, %v1287_v41  ;;  %v1533_v50 = vld [vmem:[#allocation5 + $0x2a0] sm:$0xf]  ;;  %v1770_v51 = vld [vmem:[#allocation5 + $0x2a4] sm:$0xf0]  ;;  %v1470_v52 = vor.u32 %v1754_v44, %v1469_v43 }
  0x41   :  { %822 = vmatpush.bf16.msrb.mxu3 %v1250_v3  ;;  %v1705_v53 = vld [vmem:[#allocation5 + $0xa4] sm:$0xf]  ;;  %v1279_v55 = vld [vmem:[#allocation5 + $0xa8] sm:$0xf0]  ;;  %v1218_v56 = vor.u32 %v1689_v46, %v1215_v47  ;;  %v1461_v57 = vld [vmem:[#allocation5 + $0x210] sm:$0xf]  ;;  %v1534_v61 = vor.u32 %v1770_v51, %v1533_v50 }
  0x42   :  { %794 = vmatpush.bf16.msrb.mxu1 %v1566_v7  ;;  %v1752_v58 = vld [vmem:[#allocation5 + $0x214] sm:$0xf0]  ;;  %v1687_v59 = vld [vmem:[#allocation5 + $0x14] sm:$0xf]  ;;  %v1207_v62 = vld [vmem:[#allocation5 + $0x18] sm:$0xf0]  ;;  %v1282_v2 = vor.u32 %v1705_v53, %v1279_v55 }
  0x43   :  { %781 = vmatpush.bf16.msrb.mxu0 %v1494_v13  ;;  %v1525_v0 = vld [vmem:[#allocation5 + $0x290] sm:$0xf]  ;;  %v1768_v1 = vld [vmem:[#allocation5 + $0x294] sm:$0xf0]  ;;  %v1703_v3 = vld [vmem:[#allocation5 + $0x94] sm:$0xf]  ;;  %v1462_v7 = vor.u32 %v1752_v58, %v1461_v57  ;;  %v1210_v11 = vor.u32 %v1687_v59, %v1207_v62 }
  0x44   :  { %836 = vmatpush.bf16.msra.mxu2 %v1314_v10  ;;  %v1271_v5 = vld [vmem:[#allocation5 + $0x98] sm:$0xf0]  ;;  %v1453_v6 = vld [vmem:[#allocation5 + $0x200] sm:$0xf]  ;;  %v1750_v8 = vld [vmem:[#allocation5 + $0x204] sm:$0xf0]  ;;  %v1526_v15 = vor.u32 %v1768_v1, %v1525_v0 }
  0x45   :  { %823 = vmatpush.bf16.msrb.mxu3 %v1242_v16  ;;  %v1685_v9 = vld [vmem:[#allocation5 + $0x4] sm:$0xf]  ;;  %v1199_v10 = vld [vmem:[#allocation5 + $0x8] sm:$0xf0]  ;;  %v1731_v12 = vld [vmem:[#allocation5 + $0x174] sm:$0xf]  ;;  %v1454_v23 = vor.u32 %v1750_v8, %v1453_v6 }
  0x46   :  { %795 = vmatpush.bf16.msrb.mxu1 %v1558_v19  ;;  %v1383_v13 = vld [vmem:[#allocation5 + $0x178] sm:$0xf0]  ;;  %v1763_v14 = vld [vmem:[#allocation5 + $0x274] sm:$0xf]  ;;  %v1517_v17 = vld [vmem:[#allocation5 + $0x280] sm:$0xf]  ;;  %v1274_v19 = vor.u32 %v1703_v3, %v1271_v5  ;;  %v1202_v27 = vor.u32 %v1685_v9, %v1199_v10 }
  0x47   :  { %782 = vmatpush.bf16.msrb.mxu0 %v1486_v25  ;;  %v1511_v16 = vld [vmem:[#allocation5 + $0x278] sm:$0xf0]  ;;  %v1766_v18 = vld [vmem:[#allocation5 + $0x284] sm:$0xf0]  ;;  %v108_v20 = vld [vmem:[#allocation2 + $0x20] sm:$0xff] }
  0x48   :  { %837 = vmatpush.bf16.msra.mxu2 %v1306_v22  ;;  %v115_v21 = vld [vmem:[#allocation2 + $0x58] sm:$0xff]  ;;  %v1701_v22 = vld [vmem:[#allocation5 + $0x84] sm:$0xf]  ;;  %v1747_v25 = vld [vmem:[#allocation5 + $0x1f4] sm:$0xf]  ;;  %v1514_v32 = vor.u32 %v1763_v14, %v1511_v16  ;;  %v1518_v33 = vor.u32 %v1766_v18, %v1517_v17 }
  0x49   :  { %824 = vmatpush.bf16.msrb.mxu3 %v1234_v28  ;;  %v1263_v24 = vld [vmem:[#allocation5 + $0x88] sm:$0xf0]  ;;  %v1447_v26 = vld [vmem:[#allocation5 + $0x1f8] sm:$0xf0]  ;;  %v1386_v28 = vor.u32 %v1731_v12, %v1383_v13  ;;  %v1779_v29 = vld [vmem:[#allocation5 + $0x2f4] sm:$0xf]  ;;  %v2067_v37 = vpack.c.bf16 %v115_v21, %v108_v20 }
  0x4a   :  { %796 = vmatpush.bf16.msrb.mxu1 %v1550_v31  ;;  %v1575_v30 = vld [vmem:[#allocation5 + $0x2f8] sm:$0xf0]  ;;  %v116_v34 = vld [vmem:[#allocation2 + $0x60] sm:$0xff]  ;;  %v1375_v36 = vld [vmem:[#allocation5 + $0x168] sm:$0xf0]  ;;  %v1266_v38 = vor.u32 %v1701_v22, %v1263_v24  ;;  %v1450_v41 = vor.u32 %v1747_v25, %v1447_v26 }
  0x4b   :  { %783 = vmatpush.bf16.msrb.mxu0 %v1478_v39  ;;  %1587 = vmatmul.msk.bf16.vlgmr.msrb.gmra.mxu2 %vm719_vm0, %v2063_v48  ;;  %v109_v31 = vld [vmem:[#allocation2 + $0x28] sm:$0xff]  ;;  %v1761_v39 = vld [vmem:[#allocation5 + $0x264] sm:$0xf]  ;;  %v1503_v40 = vld [vmem:[#allocation5 + $0x268] sm:$0xf0] }
  0x4c   :  { %838 = vmatpush.bf16.msra.mxu2 %v1298_v35  ;;  %v1729_v35 = vld [vmem:[#allocation5 + $0x164] sm:$0xf]  ;;  %v2069_v44 = vpack.c.bf16 %v116_v34, %v109_v31  ;;  %v1439_v46 = vld [vmem:[#allocation5 + $0x1e8] sm:$0xf0]  ;;  %v1506_v50 = vor.u32 %v1761_v39, %v1503_v40  ;;  %v1727_v51 = vld [vmem:[#allocation5 + $0x154] sm:$0xf] }
  0x4d   :  { %825 = vmatpush.bf16.msrb.mxu3 %v1226_v42  ;;  %v1578_v42 = vor.u32 %v1779_v29, %v1575_v30  ;;  %v1745_v43 = vld [vmem:[#allocation5 + $0x1e4] sm:$0xf]  ;;  %v1759_v53 = vld [vmem:[#allocation5 + $0x254] sm:$0xf]  ;;  %v1495_v55 = vld [vmem:[#allocation5 + $0x258] sm:$0xf0] }
  0x4e   :  { %797 = vmatpush.bf16.msrb.mxu1 %v1542_v45  ;;  %v1378_v45 = vor.u32 %v1729_v35, %v1375_v36  ;;  %v1777_v47 = vld [vmem:[#allocation5 + $0x2e4] sm:$0xf]  ;;  %v1743_v58 = vld [vmem:[#allocation5 + $0x1d4] sm:$0xf]  ;;  %v1559_v0 = vld [vmem:[#allocation5 + $0x2d8] sm:$0xf0]  ;;  %v1498_v1 = vor.u32 %v1759_v53, %v1495_v55 }
  0x4f   :  { %784 = vmatpush.bf16.msrb.mxu0 %v1470_v52  ;;  %v1367_v52 = vld [vmem:[#allocation5 + $0x158] sm:$0xf0]  ;;  %v1775_v62 = vld [vmem:[#allocation5 + $0x2d4] sm:$0xf]  ;;  %v1359_v3 = vld [vmem:[#allocation5 + $0x148] sm:$0xf0] }
  0x50   :  { %839 = vmatpush.bf16.msra.mxu2 %v1290_v49  ;;  %v1567_v49 = vld [vmem:[#allocation5 + $0x2e8] sm:$0xf0]  ;;  %v1370_v59 = vor.u32 %v1727_v51, %v1367_v52  ;;  %v1757_v5 = vld [vmem:[#allocation5 + $0x244] sm:$0xf]  ;;  %v1562_v8 = vor.u32 %v1775_v62, %v1559_v0  ;;  %v1755_v16 = vld [vmem:[#allocation5 + $0x234] sm:$0xf] }
  0x51   :  { %826 = vmatpush.bf16.msrb.mxu3 %v1218_v56  ;;  %v1442_v56 = vor.u32 %v1745_v43, %v1439_v46  ;;  %v1570_v57 = vor.u32 %v1777_v47, %v1567_v49  ;;  %v1487_v6 = vld [vmem:[#allocation5 + $0x248] sm:$0xf0]  ;;  %v1741_v9 = vld [vmem:[#allocation5 + $0x1c4] sm:$0xf]  ;;  %v1479_v17 = vld [vmem:[#allocation5 + $0x238] sm:$0xf0] }
  0x52   :  { %798 = vmatpush.bf16.msrb.mxu1 %v1534_v61  ;;  %v1431_v61 = vld [vmem:[#allocation5 + $0x1d8] sm:$0xf0]  ;;  %v1423_v10 = vld [vmem:[#allocation5 + $0x1c8] sm:$0xf0]  ;;  %v1490_v14 = vor.u32 %v1757_v5, %v1487_v6  ;;  %v1771_v22 = vld [vmem:[#allocation5 + $0x2b4] sm:$0xf]  ;;  %v1482_v24 = vor.u32 %v1755_v16, %v1479_v17 }
  0x53   :  { %785 = vmatpush.bf16.msrb.mxu0 %v1462_v7  ;;  %v1434_v7 = vor.u32 %v1743_v58, %v1431_v61  ;;  %v1551_v13 = vld [vmem:[#allocation5 + $0x2c8] sm:$0xf0]  ;;  %v1415_v21 = vld [vmem:[#allocation5 + $0x1b8] sm:$0xf0]  ;;  %v1721_v25 = vld [vmem:[#allocation5 + $0x124] sm:$0xf] }
  0x54   :  { %840 = vmatpush.bf16.msra.mxu2 %v1282_v2  ;;  %v1725_v2 = vld [vmem:[#allocation5 + $0x144] sm:$0xf]  ;;  %v1343_v26 = vld [vmem:[#allocation5 + $0x128] sm:$0xf0]  ;;  %v1335_v39 = vld [vmem:[#allocation5 + $0x118] sm:$0xf0] }
  0x55   :  { %827 = vmatpush.bf16.msrb.mxu3 %v1210_v11  ;;  %v1773_v11 = vld [vmem:[#allocation5 + $0x2c4] sm:$0xf]  ;;  %v1362_v12 = vor.u32 %v1725_v2, %v1359_v3  ;;  %v1535_v35 = vld [vmem:[#allocation5 + $0x2a8] sm:$0xf0]  ;;  %v1751_v40 = vld [vmem:[#allocation5 + $0x214] sm:$0xf] }
  0x56   :  { %799 = vmatpush.bf16.msrb.mxu1 %v1526_v15  ;;  %v1723_v15 = vld [vmem:[#allocation5 + $0x134] sm:$0xf]  ;;  %v1554_v18 = vor.u32 %v1773_v11, %v1551_v13  ;;  %v1737_v31 = vld [vmem:[#allocation5 + $0x1a4] sm:$0xf]  ;;  %v1399_v47 = vld [vmem:[#allocation5 + $0x198] sm:$0xf0] }
  0x57   :  { %786 = vmatpush.bf16.msrb.mxu0 %v1454_v23  ;;  %v1543_v23 = vld [vmem:[#allocation5 + $0x2b8] sm:$0xf0]  ;;  %v1769_v34 = vld [vmem:[#allocation5 + $0x2a4] sm:$0xf]  ;;  %v1767_v49 = vld [vmem:[#allocation5 + $0x294] sm:$0xf] }
  0x58   :  { %841 = vmatpush.bf16.msra.mxu2 %v1274_v19  ;;  %v1739_v19 = vld [vmem:[#allocation5 + $0x1b4] sm:$0xf]  ;;  %v1546_v30 = vor.u32 %v1771_v22, %v1543_v23  ;;  %v1538_v43 = vor.u32 %v1769_v34, %v1535_v35  ;;  %v1717_v52 = vld [vmem:[#allocation5 + $0x104] sm:$0xf]  ;;  %v1327_v53 = vld [vmem:[#allocation5 + $0x108] sm:$0xf0] }
  0x59   :  { %828 = vmatpush.bf16.msrb.mxu3 %v1202_v27  ;;  %v1753_v27 = vld [vmem:[#allocation5 + $0x224] sm:$0xf]  ;;  %v1418_v29 = vor.u32 %v1739_v19, %v1415_v21  ;;  %v1391_v62 = vld [vmem:[#allocation5 + $0x188] sm:$0xf0]  ;;  %v1788_v11 = vld [vmem:[#allocation8 + $0x28] sm:$0xff] }
  0x5a   :  { %800 = vmatpush.bf16.msrb.mxu1 %v1518_v33  ;;  %787 = vmatmul.bf16.vlgmr.msrb.gmra.mxu0 %v2067_v37  ;;  %v1407_v33 = vld [vmem:[#allocation5 + $0x1a8] sm:$0xf0]  ;;  %v1749_v55 = vld [vmem:[#allocation5 + $0x204] sm:$0xf]  ;;  %v1784_v13 = vld [vmem:[#allocation8 + $0x8] sm:$0xff] }
  0x5b   :  { %849 = vmatpush.bf16.msra.mxu0 %v1386_v28  ;;  %v1471_v28 = vld [vmem:[#allocation5 + $0x228] sm:$0xf0]  ;;  %v1733_v61 = vld [vmem:[#allocation5 + $0x184] sm:$0xf] }
  0x5c   :  { %842 = vmatpush.bf16.msra.mxu2 %v1266_v38  ;;  %829 = vmatmul.bf16.vlgmr.msrb.gmra.mxu3 %v2053_v60  ;;  %v1426_v60 = vor.u32 %v1741_v9, %v1423_v10  ;;  %v1474_v36 = vor.u32 %v1753_v27, %v1471_v28  ;;  %v1719_v38 = vld [vmem:[#allocation5 + $0x114] sm:$0xf]  ;;  %v1519_v2 = vld [vmem:[#allocation5 + $0x288] sm:$0xf0]  ;;  %v1781_v3 = vld [vmem:[#allocation5 + $0x304] sm:$0xf]  ;;  %v1394_v6 = vor.u32 %v1733_v61, %v1391_v62 }
  0x5d   :  { %877 = vmatpush.bf16.msra.mxu3 %v1514_v32  ;;  %801 = vmatmul.bf16.vlgmr.msrb.gmra.mxu1 %v2069_v44  ;;  %v1346_v32 = vor.u32 %v1721_v25, %v1343_v26  ;;  %v1338_v46 = vor.u32 %v1719_v38, %v1335_v39  ;;  %v1583_v5 = vld [vmem:[#allocation5 + $0x308] sm:$0xf0]  ;;  %v1789_v10 = vld [vmem:[#allocation8 + $0x30] sm:$0xff] }
  0x5e   :  { %863 = vmatpush.bf16.msra.mxu1 %v1450_v41  ;;  %v1463_v41 = vld [vmem:[#allocation5 + $0x218] sm:$0xf0]  ;;  %v1790_v9 = vld [vmem:[#allocation8 + $0x38] sm:$0xff] }
  0x5f   :  { %850 = vmatpush.bf16.msra.mxu0 %v1378_v45  ;;  %843 = vmatmul.bf16.vlgmr.msra.gmra.mxu2 %v2057_v4  ;;  %v1351_v4 = vld [vmem:[#allocation5 + $0x138] sm:$0xf0]  ;;  %v1735_v45 = vld [vmem:[#allocation5 + $0x194] sm:$0xf]  ;;  %v1466_v51 = vor.u32 %v1751_v40, %v1463_v41 }
  0x60   :  { %891 = vmatpush.bf16.msrb.mxu2 %v1578_v42  ;;  %v1354_v20 = vor.u32 %v1723_v15, %v1351_v4  ;;  %v1410_v42 = vor.u32 %v1737_v31, %v1407_v33  ;;  %v1783_v15 = vld [vmem:[#allocation8] sm:$0xff]  ;;  %v1798_v31 = vld [vmem:[#allocation8 + $0x78] sm:$0xff] }
  0x61   :  { %878 = vmatpush.bf16.msra.mxu3 %v1506_v50  ;;  %v1527_v50 = vld [vmem:[#allocation5 + $0x298] sm:$0xf0] }
  0x62   :  { %864 = vmatpush.bf16.msra.mxu1 %v1442_v56  ;;  %v1455_v56 = vld [vmem:[#allocation5 + $0x208] sm:$0xf0]  ;;  %v1530_v58 = vor.u32 %v1767_v49, %v1527_v50 }
  0x63   :  { %851 = vmatpush.bf16.msra.mxu0 %v1370_v59  ;;  %v1330_v59 = vor.u32 %v1717_v52, %v1327_v53  ;;  %v1458_v0 = vor.u32 %v1749_v55, %v1455_v56  ;;  %v1793_v52 = vld [vmem:[#allocation8 + $0x50] sm:$0xff]  ;;  %v1792_v55 = vld [vmem:[#allocation8 + $0x48] sm:$0xff] }
  0x64   :  { %892 = vmatpush.bf16.msrb.mxu2 %v1570_v57  ;;  %v1402_v57 = vor.u32 %v1735_v45, %v1399_v47  ;;  %v1795_v47 = vld [vmem:[#allocation8 + $0x60] sm:$0xff] }
  0x65   :  { %879 = vmatpush.bf16.msra.mxu3 %v1498_v1  ;;  %v1765_v1 = vld [vmem:[#allocation5 + $0x284] sm:$0xf] }
  0x66   :  { %865 = vmatpush.bf16.msra.mxu1 %v1434_v7  ;;  %v1522_v7 = vor.u32 %v1765_v1, %v1519_v2 }
  0x67   :  { %852 = vmatpush.bf16.msra.mxu0 %v1362_v12  ;;  %v1787_v12 = vld [vmem:[#allocation8 + $0x20] sm:$0xff] }
  0x68   :  { %893 = vmatpush.bf16.msrb.mxu2 %v1562_v8  ;;  %v1586_v8 = vor.u32 %v1781_v3, %v1583_v5 }
  0x69   :  { %880 = vmatpush.bf16.msra.mxu3 %v1490_v14 }
  0x6a   :  { %866 = vmatpush.bf16.msra.mxu1 %v1426_v60 }
  0x6b   :  { %853 = vmatpush.bf16.msra.mxu0 %v1354_v20 }
  0x6c   :  { %894 = vmatpush.bf16.msrb.mxu2 %v1554_v18 }
  0x6d   :  { %881 = vmatpush.bf16.msra.mxu3 %v1482_v24 }
  0x6e   :  { %867 = vmatpush.bf16.msra.mxu1 %v1418_v29 }
  0x6f   :  { %854 = vmatpush.bf16.msra.mxu0 %v1346_v32 }
  0x70   :  { %895 = vmatpush.bf16.msrb.mxu2 %v1546_v30 }
  0x71   :  { %882 = vmatpush.bf16.msra.mxu3 %v1474_v36  ;;  %v1797_v36 = vld [vmem:[#allocation8 + $0x70] sm:$0xff] }
  0x72   :  { %868 = vmatpush.bf16.msra.mxu1 %v1410_v42 }
  0x73   :  { %855 = vmatpush.bf16.msra.mxu0 %v1338_v46 }
  0x74   :  { %896 = vmatpush.bf16.msrb.mxu2 %v1538_v43  ;;  %v1796_v43 = vld [vmem:[#allocation8 + $0x68] sm:$0xff] }
  0x75   :  { %883 = vmatpush.bf16.msra.mxu3 %v1466_v51  ;;  %v1794_v51 = vld [vmem:[#allocation8 + $0x58] sm:$0xff] }
  0x76   :  { %869 = vmatpush.bf16.msra.mxu1 %v1402_v57  ;;  %v1791_v57 = vld [vmem:[#allocation8 + $0x40] sm:$0xff] }
  0x77   :  { %856 = vmatpush.bf16.msra.mxu0 %v1330_v59 }
  0x78   :  { %897 = vmatpush.bf16.msrb.mxu2 %v1530_v58 }
  0x79   :  { %884 = vmatpush.bf16.msra.mxu3 %v1458_v0 }
  0x7a   :  { %870 = vmatpush.bf16.msra.mxu1 %v1394_v6  ;;  %857 = vmatmul.bf16.vlgmr.msra.gmra.mxu0 %v2051_v54  ;;  %v1786_v54 = vld [vmem:[#allocation8 + $0x18] sm:$0xff] }
  0x7c   :  { %885 = vmatmul.bf16.vlgmr.msra.gmra.mxu3 %v2067_v37  ;;  %898 = vmatpush.bf16.msrb.mxu2 %v1522_v7  ;;  %v1785_v37 = vld [vmem:[#allocation8 + $0x10] sm:$0xff] }
  0x7d   :  { %871 = vmatmul.bf16.vlgmr.msra.gmra.mxu1 %v2055_v63  ;;  %v2081_v63 = vld [vmem:[#allocation7] sm:$0x3]  ;;  %1071 = vmatpush.bf16.msrb.mxu3 %v1798_v31 }
  0x7e   :  { %1057 = vmatpush.bf16.msrb.mxu1 %v1790_v9  ;;  %v225_v4 = vperm.slane %v2081_v63, 0  ;;  %v226_v62 = vperm.slane %v2081_v63, 1 }
  0x7f   :  { %899 = vmatmul.bf16.vlgmr.msrb.gmra.mxu2 %v2069_v44 }
  0x80   :  { %912 = vmatpush.bf16.msra.mxu2 %v1586_v8 }
  0x81   :  { %1072 = vmatpush.bf16.msrb.mxu3 %v1797_v36 }
  0x82   :  { %1058 = vmatpush.bf16.msrb.mxu1 %v1789_v10 }
  0x85   :  { %1073 = vmatpush.bf16.msrb.mxu3 %v1796_v43 }
  0x86   :  { %1059 = vmatpush.bf16.msrb.mxu1 %v1788_v11 }
  0x89   :  { %1074 = vmatpush.bf16.msrb.mxu3 %v1795_v47 }
  0x8a   :  { %1060 = vmatpush.bf16.msrb.mxu1 %v1787_v12 }
  0x8d   :  { %1075 = vmatpush.bf16.msrb.mxu3 %v1794_v51 }
  0x8e   :  { %1061 = vmatpush.bf16.msrb.mxu1 %v1786_v54 }
  0x8f   :  { %1588 = vmatmul.msk.bf16.vlgmr.msra.gmra.mxu2 %vm719_vm0, %v2063_v48 }
  0x91   :  { %1076 = vmatpush.bf16.msrb.mxu3 %v1793_v52 }
  0x92   :  { %1062 = vmatpush.bf16.msrb.mxu1 %v1785_v37 }
  0x95   :  { %1077 = vmatpush.bf16.msrb.mxu3 %v1792_v55 }
  0x96   :  { %1063 = vmatpush.bf16.msrb.mxu1 %v1784_v13 }
  0x99   :  { %1078 = vmatpush.bf16.msrb.mxu3 %v1791_v57 }
  0x9a   :  { %1064 = vmatpush.bf16.msrb.mxu1 %v1783_v15 }
  0xb7   :  { %v732_v44 = vpop.f32.mrf.mxu0 }
  0xb8   :  { %v733_v16 = vadd.f32 %v732_v44, %v225_v4 }
  0xba   :  { %v746_v48 = vpop.f32.mrf.mxu1 }
  0xbb   :  { %v747_v60 = vadd.f32 %v746_v48, %v733_v16 }
  0xbe   :  { %v760_v14 = vpop.f32.mrf.mxu2 }
  0xbf   :  { %v734_v17 = vpop.f32.mrf.mxu0  ;;  %v774_v19 = vpop.f32.mrf.mxu3  ;;  %v761_v22 = vadd.f32 %v760_v14, %v747_v60 }
  0xc0   :  { %v735_v21 = vadd.f32 %v734_v17, %v225_v4 }
  0xc1   :  { %v775_v25 = vadd.f32 %v774_v19, %v761_v22  ;;  %v1806_v19 = vld [vmem:[#allocation10 + $0x38] sm:$0xff]  ;;  %v1803_v22 = vld [vmem:[#allocation10 + $0x20] sm:$0xff] }
  0xc2   :  { %v748_v20 = vpop.f32.mrf.mxu1  ;;  %1156 = vmatpush.bf16.msrb.mxu0 %v1806_v19 }
  0xc3   :  { %v749_v23 = vadd.f32 %v748_v20, %v735_v21  ;;  %v1805_v20 = vld [vmem:[#allocation10 + $0x30] sm:$0xff]  ;;  %v1804_v21 = vld [vmem:[#allocation10 + $0x28] sm:$0xff] }
  0xc6   :  { %v762_v18 = vpop.f32.mrf.mxu2  ;;  %1157 = vmatpush.bf16.msrb.mxu0 %v1805_v20 }
  0xc7   :  { %v763_v28 = vadd.f32 %v762_v18, %v749_v23  ;;  %v776_v30 = vpop.f32.mrf.mxu3  ;;  %v1802_v23 = vld [vmem:[#allocation10 + $0x18] sm:$0xff] }
  0xc9   :  { %v777_v32 = vadd.f32 %v776_v30, %v763_v28 }
  0xca   :  { %1158 = vmatpush.bf16.msrb.mxu0 %v1804_v21 }
  0xce   :  { %v816_v26 = vpop.f32.mrf.mxu2  ;;  %1159 = vmatpush.bf16.msrb.mxu0 %v1803_v22 }
  0xd2   :  { %1160 = vmatpush.bf16.msrb.mxu0 %v1802_v23 }
  0xd6   :  { %v818_v40 = vpop.f32.mrf.mxu2 }
  0xd7   :  { %v788_v24 = vpop.f32.mrf.mxu0 }
  0xd8   :  { %v789_v29 = vadd.f32 %v788_v24, %v775_v25  ;;  %v1801_v24 = vld [vmem:[#allocation10 + $0x10] sm:$0xff]  ;;  %v1800_v25 = vld [vmem:[#allocation10 + $0x8] sm:$0xff] }
  0xd9   :  { %1161 = vmatpush.bf16.msrb.mxu0 %v1801_v24 }
  0xda   :  { %v802_v27 = vpop.f32.mrf.mxu1 }
  0xdb   :  { %v803_v33 = vadd.f32 %v802_v27, %v789_v29  ;;  %v1824_v29 = vld [vmem:[%s2101_s4] ss:$0 sm:$0xff] }
  0xdd   :  { %v817_v39 = vadd.f32 %v816_v26, %v803_v33  ;;  %1162 = vmatpush.bf16.msrb.mxu0 %v1800_v25  ;;  %v1799_v26 = vld [vmem:[#allocation10] sm:$0xff] }
  0xdf   :  { %v790_v34 = vpop.f32.mrf.mxu0  ;;  %v919_v45 = vmax.f32 %v817_v39, 0.0  ;;  %v830_v53 = vpop.f32.mrf.mxu3 }
  0xe0   :  { %v791_v35 = vadd.f32 %v790_v34, %v777_v32  ;;  %v831_v1 = vadd.f32 %v830_v53, %v226_v62 }
  0xe1   :  { %1163 = vmatpush.bf16.msrb.mxu0 %v1799_v26 }
  0xe2   :  { %v804_v38 = vpop.f32.mrf.mxu1  ;;  %v844_v50 = vpop.f32.mrf.mxu2 }
  0xe3   :  { %v805_v41 = vadd.f32 %v804_v38, %v791_v35  ;;  %v845_v6 = vadd.f32 %v844_v50, %v831_v1 }
  0xe5   :  { %v819_v42 = vadd.f32 %v818_v40, %v805_v41  ;;  %v1825_v41 = vld [vmem:[%s2103_s6] ss:$0 sm:$0xff] }
  0xe7   :  { %v921_v46 = vmax.f32 %v819_v42, 0.0  ;;  %v832_v58 = vpop.f32.mrf.mxu3 }
  0xe8   :  { %v833_v3 = vadd.f32 %v832_v58, %v226_v62 }
  0xe9   :  { %v923_v49 = vpack.c.bf16 %v921_v46, %v919_v45 }
  0xea   :  { %v846_v56 = vpop.f32.mrf.mxu2 }
  0xeb   :  { %1065 = vmatmul.bf16.vlgmr.msrb.gmra.mxu1 %v923_v49  ;;  %v847_v8 = vadd.f32 %v846_v56, %v833_v3 }
  0xf7   :  { %v858_v59 = vpop.f32.mrf.mxu0 }
  0xf8   :  { %v859_v9 = vadd.f32 %v858_v59, %v845_v6 }
  0xfa   :  { %v872_v0 = vpop.f32.mrf.mxu1 }
  0xfb   :  { %v873_v12 = vadd.f32 %v872_v0, %v859_v9 }
  0xff   :  { %v886_v2 = vpop.f32.mrf.mxu3  ;;  %v860_v7 = vpop.f32.mrf.mxu0 }
 0x100   :  { %v861_v10 = vadd.f32 %v860_v7, %v847_v8  ;;  %v887_v13 = vadd.f32 %v886_v2, %v873_v12 }
 0x102   :  { %v900_v61 = vpop.f32.mrf.mxu2  ;;  %v874_v11 = vpop.f32.mrf.mxu1 }
 0x103   :  { %v875_v44 = vadd.f32 %v874_v11, %v861_v10  ;;  %v901_v15 = vadd.f32 %v900_v61, %v887_v13 }
 0x107   :  { %v888_v54 = vpop.f32.mrf.mxu3 }
 0x108   :  { %v889_v14 = vadd.f32 %v888_v54, %v875_v44 }
 0x10a   :  { %v902_v5 = vpop.f32.mrf.mxu2 }
 0x10b   :  { %v903_v48 = vadd.f32 %v902_v5, %v889_v14 }
 0x112   :  { %v914_v37 = vpop.f32.mrf.mxu2 }
 0x113   :  { %v915_v63 = vadd.f32 %v914_v37, %v901_v15 }
 0x115   :  { %v920_v17 = vmax.f32 %v915_v63, 0.0 }
 0x11a   :  { %v916_v4 = vpop.f32.mrf.mxu2 }
 0x11b   :  { %v917_v16 = vadd.f32 %v916_v4, %v903_v48 }
 0x11d   :  { %v922_v60 = vmax.f32 %v917_v16, 0.0 }
 0x11f   :  { %v924_v18 = vpack.c.bf16 %v922_v60, %v920_v17 }
 0x121   :  { %1079 = vmatmul.bf16.vlgmr.msrb.gmra.mxu3 %v924_v18 }
 0x168   :  { %v1066_v27 = vpop.f32.mrf.mxu1 }
 0x169   :  { %v1067_v31 = vadd.f32 %v1824_v29, %v1066_v27 }
 0x170   :  { %v1068_v30 = vpop.f32.mrf.mxu1 }
 0x171   :  { %v1069_v32 = vadd.f32 %v1824_v29, %v1068_v30 }
 0x1a4   :  { %v1080_v28 = vpop.f32.mrf.mxu3 }
 0x1a5   :  { %v1081_v33 = vadd.f32 %v1080_v28, %v1067_v31 }
 0x1a7   :  { %v1085_v36 = vmax.f32 %v1081_v33, 0.0 }
 0x1ac   :  { %v1082_v34 = vpop.f32.mrf.mxu3 }
 0x1ad   :  { %v1083_v35 = vadd.f32 %v1082_v34, %v1069_v32 }
 0x1af   :  { %v1086_v38 = vmax.f32 %v1083_v35, 0.0 }
 0x1b1   :  { %v1087_v39 = vpack.c.bf16 %v1086_v38, %v1085_v36 }
 0x1b3   :  { %1164 = vmatmul.bf16.vlgmr.msrb.gmra.mxu0 %v1087_v39 }
 0x230   :  { %v1165_v40 = vpop.f32.mrf.mxu0 }
 0x231   :  { %v1166_v43 = vadd.f32 %v1825_v41, %v1165_v40 }
 0x238   :  { %v1167_v42 = vpop.f32.mrf.mxu0 }
 0x239   :  { %v1168_v45 = vadd.f32 %v1825_v41, %v1167_v42 }
 0x23b   :  { %v1810_v46 = vpack.c.bf16 %v1168_v45, %v1166_v43 }
 0x23d   :  { %1811 = vst [vmem:[#allocation11] sm:$0xff] %v1810_v46  }
 0x23e   :  { %1186 = dma.vmem_to_hbm [thread:$0]  %s1179_s9, 128, %s1181_s11, [#allocation4], %s1982_s13, %s1982_s13, %s1983_s14  }
 0x23f   :  { %1976 = dma.done.wait [#allocation4], 128  }
 0x240   :  { %1977 = vsyncadd [#allocation4], 4294967168 }
 0x241   :  { %1191 = vsyncpa [#allocation3], 1 }
 0x242   :  { %1192 = vsyncpa [#allocation6], 1 }
 0x243   :  { %1193 = vsyncpa [#allocation9], 1 }
 0x244   :  { %1194 = vsyncpa [#allocation4], 1 }

</bundles_post_ra>
